<compile_context>
chip_gen: v6e
topology: v6e:2x2x1
jax: 0.10.0
libtpu: 0.0.40
codegen_flags: <defaults>
</compile_context>

<pallas_src>
import jax
import jax.numpy as jnp
from jax.experimental import pallas as pl
from jax.experimental.pallas import tpu as pltpu


def _round_up(x, m):
    return ((x + m - 1) // m) * m


def _vmem_capacity_bytes():
    """Physical VMEM per TensorCore (128 MiB v5e/v6e, 64 MiB v7x)."""
    try:
        return int(pltpu.get_tpu_info().vmem_capacity_bytes)
    except Exception:
        return 64 * 1024 * 1024  # conservative (v7x-sized) fallback


# -----------------------------------------------------------------------------
# Kernel.  Grid = (batch tiles i ["parallel"], hidden-dim tiles k [reduction]).
#   y[i] = relu(x[i] @ W1 + b1) @ W2 + b2, accumulated over k-slabs of D1.
# -----------------------------------------------------------------------------
def _make_expert_kernel(acc_in_output):
    def kernel(x_ref, w1_ref, b1_ref, w2_ref, b2_ref, o_ref, *scratch):
        k = pl.program_id(1)
        acc = o_ref if acc_in_output else scratch[0]

        @pl.when(k == 0)
        def _init():
            # Fold b2 into the accumulator initialization.
            acc[...] = jnp.broadcast_to(
                b2_ref[...].astype(acc.dtype), acc.shape)

        # h_k = relu(x @ W1[:, k-slab] + b1[k-slab])          -> (TM, TK) f32
        h = jnp.dot(x_ref[...], w1_ref[...],
                    preferred_element_type=jnp.float32)
        b1_k = b1_ref[pl.ds(k, 1), :].astype(jnp.float32)      # (1, TK), pinned
        h = jnp.maximum(h + b1_k, 0.0)

        # y += h_k @ W2[k-slab, :]
        acc[...] += jnp.dot(
            h.astype(w2_ref.dtype), w2_ref[...],
            preferred_element_type=jnp.float32,
        ).astype(acc.dtype)

        if not acc_in_output:
            @pl.when(k == pl.num_programs(1) - 1)
            def _finalize():
                o_ref[...] = acc[...].astype(o_ref.dtype)

    return kernel


# -----------------------------------------------------------------------------
# Parameter preparation: pad weights to 128-aligned shapes ONCE.
# -----------------------------------------------------------------------------
def prepare_expert_params(w1, b1, w2, b2):
    """w1: (D0, D1), b1: (1, D1) or (D1,), w2: (D1, D2), b2: (1, D2) or (D2,)."""
    b1 = b1.reshape(1, -1)
    b2 = b2.reshape(1, -1)
    D0, D1 = w1.shape
    D2 = w2.shape[1]
    D0p, D1p, D2p = (_round_up(d, 128) for d in (D0, D1, D2))
    # Zero padding keeps the math exact: padded W1 cols & b1 entries are 0,
    # relu(0) = 0, padded W2 rows contribute 0.
    return {
        "w1": jnp.pad(w1, ((0, D0p - D0), (0, D1p - D1))),
        "b1": jnp.pad(b1, ((0, 0), (0, D1p - D1))),
        "w2": jnp.pad(w2, ((0, D1p - D1), (0, D2p - D2))),
        "b2": jnp.pad(b2, ((0, 0), (0, D2p - D2))),
        "dims": (D0, D1, D2),
    }


# -----------------------------------------------------------------------------
# Forward pass.
# -----------------------------------------------------------------------------
def expert_forward(x, params):
    w1p, b1p, w2p, b2p = params["w1"], params["b1"], params["w2"], params["b2"]
    D0, D1, D2 = params["dims"]
    B = x.shape[0]
    assert x.shape[1] == D0, "x feature dim must match Expert input dim"

    D0p, D1p = w1p.shape
    D2p = w2p.shape[1]

    out_dtype = x.dtype
    acc_in_output = jnp.dtype(out_dtype) == jnp.dtype(jnp.float32)

    x_is = jnp.dtype(x.dtype).itemsize
    w_is = jnp.dtype(w1p.dtype).itemsize
    o_is = jnp.dtype(out_dtype).itemsize

    # Sub-32-bit dtypes pack rows along sublanes: 8 rows f32, 16 bf16, 32 int8.
    sub = max(8, 32 // x_is)

    vmem_cap = _vmem_capacity_bytes()
    budget = int(vmem_cap * 0.75)                     # ~96 MiB v5e/v6e, ~48 MiB v7x
    two_tensorcores = vmem_cap <= 64 * 1024 * 1024    # v7x heuristic (2 TCs)

    def vmem_bytes(tm, tk):
        # Double-buffered pipeline inputs + output, plus the resident scratch
        # accumulator and the materialized (tm, tk) f32 intermediate `h`.
        in_b = (tm * D0p * x_is          # x tile
                + D0p * tk * w_is        # W1 column slab
                + D1p * w_is             # b1 (pinned, whole)
                + tk * D2p * w_is        # W2 row slab
                + D2p * w_is)            # b2 (pinned)
        out_b = tm * D2p * o_is
        acc_b = 0 if acc_in_output else tm * D2p * 4
        h_b = tm * tk * 4
        return 2 * (in_b + out_b) + acc_b + h_b

    # ---- tile selection ------------------------------------------------------
    # TM first (weight HBM traffic scales as ceil(B/TM) * (|W1| + |W2|)), then
    # the largest TK that fits; TK < 256 only as a last resort before TM shrinks.
    if B < 128:
        tm_cands = [_round_up(B, sub)]
    else:
        bp128 = _round_up(B, 128)
        tm_cands = [c for c in (1024, 512, 256, 128) if c <= bp128]
    tk_cands = [t for t in (2048, 1024, 512, 256, 128) if D1p % t == 0]

    TM, TK = tm_cands[-1], tk_cands[-1]
    found = False
    for tm in tm_cands:
        for tk in tk_cands:
            if vmem_bytes(tm, tk) <= budget:
                TM, TK = tm, tk
                found = True
                break
        if found:
            break

    # v7x has 2 TensorCores: give the "parallel" batch axis >= 2 tiles when the
    # batch is big enough, so the second core isn't idle (1-TC chips unaffected).
    if two_tensorcores and _round_up(B, TM) // TM < 2:
        half = TM // 2
        if half >= sub and half % sub == 0 and B > half:
            TM = half

    Bp = _round_up(B, TM)
    grid = (Bp // TM, D1p // TK)

    # Only x is padded per call (weights were padded once in prepare_*).
    xp = jnp.pad(x, ((0, Bp - B), (0, D0p - D0)))
    b1_blk = b1p.reshape(D1p // TK, TK)       # row k <-> W1 column-slab k

    scratch_shapes = (
        [] if acc_in_output else [pltpu.VMEM((TM, D2p), jnp.float32)]
    )

    vmem_limit = int(min(vmem_cap * 0.85,
                         max(32 * 1024 * 1024, vmem_bytes(TM, TK) * 1.25)))

    out = pl.pallas_call(
        _make_expert_kernel(acc_in_output),
        out_shape=jax.ShapeDtypeStruct((Bp, D2p), out_dtype),
        grid_spec=pltpu.PrefetchScalarGridSpec(
            num_scalar_prefetch=0,
            grid=grid,
            in_specs=[
                pl.BlockSpec((TM, D0p), lambda i, k: (i, 0)),        # x rows
                pl.BlockSpec((D0p, TK), lambda i, k: (0, k)),        # W1 slab
                pl.BlockSpec((D1p // TK, TK), lambda i, k: (0, 0)),  # b1 (pinned)
                pl.BlockSpec((TK, D2p), lambda i, k: (k, 0)),        # W2 slab
                pl.BlockSpec((1, D2p), lambda i, k: (0, 0)),         # b2 (pinned)
            ],
            out_specs=pl.BlockSpec((TM, D2p), lambda i, k: (i, 0)),
            scratch_shapes=scratch_shapes,
        ),
        compiler_params=pltpu.CompilerParams(
            dimension_semantics=("parallel", "arbitrary"),
            vmem_limit_bytes=vmem_limit,
        ),
    )(xp, w1p, b1_blk, w2p, b2p)

    # Strip padding back to the logical result.
    return out[:B, :D2]


def init_expert_params(key, dims, dtype=jnp.float32):
    """Deterministic init mimicking nn.Linear (uniform in +-1/sqrt(fan_in))."""
    d0, d1, d2 = dims
    k1, k2, k3, k4 = jax.random.split(key, 4)
    lim1 = 1.0 / jnp.sqrt(d0)
    lim2 = 1.0 / jnp.sqrt(d1)
    w1 = jax.random.uniform(k1, (d0, d1), dtype, -lim1, lim1)
    b1 = jax.random.uniform(k2, (1, d1), dtype, -lim1, lim1)
    w2 = jax.random.uniform(k3, (d1, d2), dtype, -lim2, lim2)
    b2 = jax.random.uniform(k4, (1, d2), dtype, -lim2, lim2)
    return w1, b1, w2, b2


if __name__ == "__main__":
    # Expert(dims=[in, hidden, out]) at small shapes.
    dims = (32, 64, 16)
    batch = 8

    key = jax.random.PRNGKey(0)
    kx, kp = jax.random.split(key)
    x = jax.random.normal(kx, (batch, dims[0]), dtype=jnp.float32)
    w1, b1, w2, b2 = init_expert_params(kp, dims)

    # f32 path (accumulates directly into the resident output block).
    params = prepare_expert_params(w1, b1, w2, b2)
    out = jax.block_until_ready(expert_forward(x, params))
    ref = jnp.maximum(x @ w1 + b1, 0.0) @ w2 + b2
    assert out.shape == (batch, dims[2])
    assert jnp.allclose(out, ref, atol=1e-5, rtol=1e-5)

    # Unaligned dims + multiple hidden-dim reduction steps (exercises the
    # pinned-b1 dynamic slice and the multi-k accumulator path), f32.
    dims2 = (100, 300, 70)
    batch2 = 40
    k2x, k2p = jax.random.split(jax.random.PRNGKey(1))
    x2 = jax.random.normal(k2x, (batch2, dims2[0]), dtype=jnp.float32)
    q1, qb1, q2, qb2 = init_expert_params(k2p, dims2)
    params2 = prepare_expert_params(q1, qb1, q2, qb2)
    out2 = jax.block_until_ready(expert_forward(x2, params2))
    ref2 = jnp.maximum(x2 @ q1 + qb1, 0.0) @ q2 + qb2
    assert out2.shape == (batch2, dims2[2])
    assert jnp.allclose(out2, ref2, atol=1e-4, rtol=1e-4)

    # bf16 path (f32 scratch accumulator + final cast), looser tolerance.
    xb = x.astype(jnp.bfloat16)
    w1b, b1b, w2b, b2b = (a.astype(jnp.bfloat16) for a in (w1, b1, w2, b2))
    params_b = prepare_expert_params(w1b, b1b, w2b, b2b)
    out_b = jax.block_until_ready(expert_forward(xb, params_b))
    ref_b = (jnp.maximum(xb.astype(jnp.float32) @ w1b.astype(jnp.float32)
                         + b1b.astype(jnp.float32), 0.0)
             @ w2b.astype(jnp.float32) + b2b.astype(jnp.float32))
    assert out_b.shape == (batch, dims[2])
    assert jnp.allclose(out_b.astype(jnp.float32), ref_b, atol=5e-2, rtol=5e-2)

    print("KERNEL_OK")
</pallas_src>

<mosaic_0001>
module attributes {stable_mosaic.version = 11 : i64} {
  func.func @kernel(%arg0: i32, %arg1: i32, %arg2: memref<8x128xf32, #tpu.memory_space<vmem>>, %arg3: memref<128x128xf32, #tpu.memory_space<vmem>>, %arg4: memref<1x128xf32, #tpu.memory_space<vmem>>, %arg5: memref<128x128xf32, #tpu.memory_space<vmem>>, %arg6: memref<1x128xf32, #tpu.memory_space<vmem>>, %arg7: memref<8x128xf32, #tpu.memory_space<vmem>>) attributes {dimension_semantics = [#tpu.dimension_semantics<parallel>, #tpu.dimension_semantics<arbitrary>], iteration_bounds = array<i64: 1, 1>, scalar_prefetch = 0 : i64, scratch_operands = 0 : i64, tpu.core_type = #tpu.core_type<tc>, window_params = [{transform_indices = @transform_0, window_bounds = array<i64: 8, 128>}, {transform_indices = @transform_1, window_bounds = array<i64: 128, 128>}, {pipeline_mode = #tpu.pipeline_mode<synchronous>, transform_indices = @transform_2, window_bounds = array<i64: 1, 128>}, {transform_indices = @transform_3, window_bounds = array<i64: 128, 128>}, {pipeline_mode = #tpu.pipeline_mode<synchronous>, transform_indices = @transform_4, window_bounds = array<i64: 1, 128>}, {transform_indices = @transform_5, window_bounds = array<i64: 8, 128>}]} {
    %c0_i32 = arith.constant 0 : i32
    %0 = arith.cmpi eq, %arg1, %c0_i32 : i32
    %1 = arith.extui %0 : i1 to i32
    %c0_i32_0 = arith.constant 0 : i32
    %2 = arith.cmpi ne, %1, %c0_i32_0 : i32
    scf.if %2 {
      %c0_13 = arith.constant 0 : index
      %c0_14 = arith.constant 0 : index
      %17 = vector.load %arg6[%c0_13, %c0_14] : memref<1x128xf32, #tpu.memory_space<vmem>>, vector<1x128xf32>
      %18 = vector.shape_cast %17 : vector<1x128xf32> to vector<1x128xf32>
      %19 = vector.broadcast %18 : vector<1x128xf32> to vector<8x128xf32>
      %c0_15 = arith.constant 0 : index
      %c0_16 = arith.constant 0 : index
      %20 = vector.load %arg7[%c0_15, %c0_16] : memref<8x128xf32, #tpu.memory_space<vmem>>, vector<8x128xf32>
      tpu.vector_store %arg7[%c0_15, %c0_16], %19 {strides = array<i32>} : memref<8x128xf32, #tpu.memory_space<vmem>>, vector<8x128xf32>,
    } else {
    }
    %c0 = arith.constant 0 : index
    %c0_1 = arith.constant 0 : index
    %3 = vector.load %arg2[%c0, %c0_1] : memref<8x128xf32, #tpu.memory_space<vmem>>, vector<8x128xf32>
    %c0_2 = arith.constant 0 : index
    %c0_3 = arith.constant 0 : index
    %4 = vector.load %arg3[%c0_2, %c0_3] : memref<128x128xf32, #tpu.memory_space<vmem>>, vector<128x128xf32>
    %cst = arith.constant dense<0.000000e+00> : vector<8x128xf32>
    %5 = tpu.matmul %3, %4, %cst {dimension_numbers = #tpu.dot_dimension_numbers<[1], [0], [0], [1], [0, 0, 1, 1], [], []>} : vector<8x128xf32>, vector<128x128xf32>, vector<8x128xf32> -> vector<8x128xf32>
    %6 = arith.index_cast %arg1 : i32 to index
    %c0_4 = arith.constant 0 : index
    %7 = vector.load %arg4[%6, %c0_4] : memref<1x128xf32, #tpu.memory_space<vmem>>, vector<1x128xf32>
    %8 = vector.broadcast %7 : vector<1x128xf32> to vector<8x128xf32>
    %9 = arith.addf %5, %8 : vector<8x128xf32>
    %cst_5 = arith.constant 0.000000e+00 : f32
    %10 = vector.broadcast %cst_5 : f32 to vector<8x128xf32>
    %11 = arith.maximumf %9, %10 : vector<8x128xf32>
    %c0_6 = arith.constant 0 : index
    %c0_7 = arith.constant 0 : index
    %12 = vector.load %arg7[%c0_6, %c0_7] : memref<8x128xf32, #tpu.memory_space<vmem>>, vector<8x128xf32>
    %c0_8 = arith.constant 0 : index
    %c0_9 = arith.constant 0 : index
    %13 = vector.load %arg5[%c0_8, %c0_9] : memref<128x128xf32, #tpu.memory_space<vmem>>, vector<128x128xf32>
    %cst_10 = arith.constant dense<0.000000e+00> : vector<8x128xf32>
    %14 = tpu.matmul %11, %13, %cst_10 {dimension_numbers = #tpu.dot_dimension_numbers<[1], [0], [0], [1], [0, 0, 1, 1], [], []>} : vector<8x128xf32>, vector<128x128xf32>, vector<8x128xf32> -> vector<8x128xf32>
    %15 = arith.addf %12, %14 : vector<8x128xf32>
    %c0_11 = arith.constant 0 : index
    %c0_12 = arith.constant 0 : index
    %16 = vector.load %arg7[%c0_11, %c0_12] : memref<8x128xf32, #tpu.memory_space<vmem>>, vector<8x128xf32>
    tpu.vector_store %arg7[%c0_11, %c0_12], %15 {strides = array<i32>} : memref<8x128xf32, #tpu.memory_space<vmem>>, vector<8x128xf32>,
    return
  }
  func.func @transform_0(%arg0: i32, %arg1: i32) -> (i32, i32) {
    %c0_i32 = arith.constant 0 : i32
    %c0_i32_0 = arith.constant 0 : i32
    return %arg0, %c0_i32 : i32, i32
  }
  func.func @transform_1(%arg0: i32, %arg1: i32) -> (i32, i32) {
    %c0_i32 = arith.constant 0 : i32
    %c0_i32_0 = arith.constant 0 : i32
    return %c0_i32, %arg1 : i32, i32
  }
  func.func @transform_2(%arg0: i32, %arg1: i32) -> (i32, i32) {
    %c0_i32 = arith.constant 0 : i32
    %c0_i32_0 = arith.constant 0 : i32
    %c0_i32_1 = arith.constant 0 : i32
    return %c0_i32, %c0_i32_0 : i32, i32
  }
  func.func @transform_3(%arg0: i32, %arg1: i32) -> (i32, i32) {
    %c0_i32 = arith.constant 0 : i32
    %c0_i32_0 = arith.constant 0 : i32
    return %arg1, %c0_i32 : i32, i32
  }
  func.func @transform_4(%arg0: i32, %arg1: i32) -> (i32, i32) {
    %c0_i32 = arith.constant 0 : i32
    %c0_i32_0 = arith.constant 0 : i32
    %c0_i32_1 = arith.constant 0 : i32
    return %c0_i32, %c0_i32_0 : i32, i32
  }
  func.func @transform_5(%arg0: i32, %arg1: i32) -> (i32, i32) {
    %c0_i32 = arith.constant 0 : i32
    %c0_i32_0 = arith.constant 0 : i32
    return %arg0, %c0_i32 : i32, i32
  }
}

</mosaic_0001>

<bundles_post_ra>
// kernel: tpu_custom_call.1
= control target key start
LH: loop header
LB: loop body
LE: loop exit
PB: predicated region body
PF: predicated region fallthrough
CT: control target
= control target key end

     0   :  { %10 = vsyncpa [#allocation3], 0  ;;  %s562_s0 = inlined_call_operand.hbm [shape: f32[8,128], index: 0, kind: input, shape index: {}]   ;;  %s563_s1 = inlined_call_operand.hbm [shape: f32[128,128], index: 1, kind: input, shape index: {}]   ;;  %s564_s2 = inlined_call_operand.vmem [shape: f32[1,128], index: 2, kind: input, shape index: {}]   ;;  %s565_s3 = inlined_call_operand.hbm [shape: f32[128,128], index: 3, kind: input, shape index: {}]   ;;  %s566_s4 = inlined_call_operand.vmem [shape: f32[1,128], index: 4, kind: input, shape index: {}]   ;;  %s567_s5 = inlined_call_operand.hbm [shape: f32[8,128], index: 5, kind: output, shape index: {}]  }
   0x1   :  { %11 = vsyncpa [#allocation6], 0 }
   0x2   :  { %12 = vsyncpa [#allocation4], 0  ;;  %s472_s18 = smov [#allocation5]  }
   0x3   :  { %s28_s19 = sshll.u32 %s472_s18, 4  ;;  %s29_s19 = int_to_ptr.vmem [resolvable:$true] %s28_s19 }
   0x4   :  { %s394_s20 = scalar_lea.vmem %s29_s19, 2048  ;;  %p399_p1 = scmp.lt.s32.totalorder %s29_s19, %s29_s19 }
   0x5   :  { %p395_p0 = scmp.ne.s32.totalorder %s29_s19, %s394_s20  ;;  %p400_p2 = scmp.lt.s32.totalorder %s394_s20, %s394_s20 }
   0x7   :  { %p401_p3 = por %p400_p2, %p399_p1 }
   0x9   :  { %p402_p4 = pnand %p401_p3, %p395_p0 }
   0xb   :  { %405 = shalt.err (!%p402_p4)
}
   0xc   :  { %s473_s21 = smov 128   ;;  %s474_s22 = smov 8  }
   0xd   :  { %34 = dma.hbm_to_vmem [thread:$0]  %s563_s1, 2048, %s29_s19, [#allocation6], %s473_s21, %s473_s21, %s474_s22  }
   0xe   :  { %s475_s25 = smov [#allocation2]   ;;  %s476_s27 = smov [#allocation7]  }
   0xf   :  { %s19_s26 = sshll.u32 %s475_s25, 4  ;;  %s42_s28 = sshll.u32 %s476_s27, 4  ;;  %s20_s26 = int_to_ptr.vmem [resolvable:$true] %s19_s26  ;;  %s43_s28 = int_to_ptr.vmem [resolvable:$true] %s42_s28 }
  0x10   :  { %s414_s29 = scalar_lea.vmem %s20_s26, 128  ;;  %p419_p6 = scmp.lt.s32.totalorder %s20_s26, %s20_s26 }
  0x11   :  { %p415_p5 = scmp.ne.s32.totalorder %s20_s26, %s414_s29  ;;  %p420_p7 = scmp.lt.s32.totalorder %s414_s29, %s414_s29 }
  0x13   :  { %p421_p8 = por %p420_p7, %p419_p6 }
  0x15   :  { %p422_p9 = pnand %p421_p8, %p415_p5 }
  0x17   :  { %425 = shalt.err (!%p422_p9)
}
  0x18   :  { %22 = dma.hbm_to_vmem [thread:$0]  %s562_s0, 128, %s20_s26, [#allocation3]  }
  0x19   :  { %s434_s7 = scalar_lea.vmem %s43_s28, 2048  ;;  %p439_p11 = scmp.lt.s32.totalorder %s43_s28, %s43_s28 }
  0x1a   :  { %p435_p10 = scmp.ne.s32.totalorder %s43_s28, %s434_s7  ;;  %p440_p12 = scmp.lt.s32.totalorder %s434_s7, %s434_s7 }
  0x1c   :  { %p441_p13 = por %p440_p12, %p439_p11 }
  0x1e   :  { %p442_p0 = pnand %p441_p13, %p435_p10 }
  0x20   :  { %445 = shalt.err (!%p442_p0)
}
  0x21   :  { %48 = dma.hbm_to_vmem [thread:$0]  %s565_s3, 2048, %s43_s28, [#allocation6], %s473_s21, %s473_s21, %s474_s22  }
  0x22   :  { %466 = dma.done.wait [#allocation3], 128  }
  0x23   :  { %467 = vsyncadd [#allocation3], 4294967168 }
  0x24   :  { %468 = dma.done.wait [#allocation6], 4096  }
  0x25   :  { %469 = vsyncadd [#allocation6], 4294963200  ;;  %v477_v0 = vmov 0.0   ;;  %vm478_vm0 = vmmov 0   ;;  %v88_v1 = vld [vmem:[#allocation5 + $0x78] sm:$0xff]  ;;  %v87_v2 = vld [vmem:[#allocation5 + $0x70] sm:$0xff] }
  0x26   :  { %308 = vmatprep.subr.mxu0 %v477_v0  ;;  %340 = vmatprep.mubr.msk.f32.mxu0 %vm478_vm0, %v477_v0  ;;  %v86_v3 = vld [vmem:[#allocation5 + $0x68] sm:$0xff]  ;;  %v85_v4 = vld [vmem:[#allocation5 + $0x60] sm:$0xff]  ;;  %v183_v5 = vld [vmem:[#allocation7 + $0x78] sm:$0xff]  ;;  %s479_s11 = smov [#allocation8]  }
  0x27   :  { %343 = vmatprep.subr.mxu1 %v477_v0  ;;  %375 = vmatprep.mubr.msk.f32.mxu1 %vm478_vm0, %v477_v0  ;;  %v84_v6 = vld [vmem:[#allocation5 + $0x58] sm:$0xff]  ;;  %v182_v7 = vld [vmem:[#allocation7 + $0x70] sm:$0xff]  ;;  %v181_v8 = vld [vmem:[#allocation7 + $0x68] sm:$0xff]  ;;  %s262_s12 = sshll.u32 %s479_s11, 4  ;;  %s263_s12 = int_to_ptr.vmem [resolvable:$true] %s262_s12 }
  0x28   :  { %309 = vmatpush3.msra.mxu0 %v88_v1  ;;  %344 = vmatpush3.msra.mxu1 %v183_v5  ;;  %v83_v9 = vld [vmem:[#allocation5 + $0x50] sm:$0xff]  ;;  %v180_v10 = vld [vmem:[#allocation7 + $0x60] sm:$0xff]  ;;  %v82_v11 = vld [vmem:[#allocation5 + $0x48] sm:$0xff]  ;;  %s446_s13 = scalar_lea.vmem %s263_s12, 128  ;;  %p451_p2 = scmp.lt.s32.totalorder %s263_s12, %s263_s12 }
  0x29   :  { %310 = vmatprep.subr.mxu0 %v477_v0  ;;  %345 = vmatprep.subr.mxu1 %v477_v0  ;;  %v179_v12 = vld [vmem:[#allocation7 + $0x58] sm:$0xff]  ;;  %v81_v13 = vld [vmem:[#allocation5 + $0x40] sm:$0xff]  ;;  %v178_v14 = vld [vmem:[#allocation7 + $0x50] sm:$0xff]  ;;  %p447_p1 = scmp.ne.s32.totalorder %s263_s12, %s446_s13  ;;  %p452_p3 = scmp.lt.s32.totalorder %s446_s13, %s446_s13 }
  0x2a   :  { %311 = vmatpush3.msra.mxu0 %v87_v2  ;;  %346 = vmatpush3.msra.mxu1 %v182_v7  ;;  %v80_v15 = vld [vmem:[#allocation5 + $0x38] sm:$0xff]  ;;  %v177_v16 = vld [vmem:[#allocation7 + $0x48] sm:$0xff]  ;;  %v79_v17 = vld [vmem:[#allocation5 + $0x30] sm:$0xff] }
  0x2b   :  { %312 = vmatprep.subr.mxu0 %v477_v0  ;;  %347 = vmatprep.subr.mxu1 %v477_v0  ;;  %v176_v18 = vld [vmem:[#allocation7 + $0x40] sm:$0xff]  ;;  %v78_v19 = vld [vmem:[#allocation5 + $0x28] sm:$0xff]  ;;  %v175_v20 = vld [vmem:[#allocation7 + $0x38] sm:$0xff]  ;;  %p453_p4 = por %p452_p3, %p451_p2 }
  0x2c   :  { %313 = vmatpush3.msra.mxu0 %v86_v3  ;;  %348 = vmatpush3.msra.mxu1 %v181_v8  ;;  %v77_v21 = vld [vmem:[#allocation5 + $0x20] sm:$0xff]  ;;  %v174_v22 = vld [vmem:[#allocation7 + $0x30] sm:$0xff]  ;;  %v76_v23 = vld [vmem:[#allocation5 + $0x18] sm:$0xff] }
  0x2d   :  { %314 = vmatprep.subr.mxu0 %v477_v0  ;;  %349 = vmatprep.subr.mxu1 %v477_v0  ;;  %v173_v24 = vld [vmem:[#allocation7 + $0x28] sm:$0xff]  ;;  %v75_v25 = vld [vmem:[#allocation5 + $0x10] sm:$0xff]  ;;  %v172_v26 = vld [vmem:[#allocation7 + $0x20] sm:$0xff]  ;;  %p454_p5 = pnand %p453_p4, %p447_p1 }
  0x2e   :  { %315 = vmatpush3.msra.mxu0 %v85_v4  ;;  %350 = vmatpush3.msra.mxu1 %v180_v10  ;;  %v74_v27 = vld [vmem:[#allocation5 + $0x8] sm:$0xff]  ;;  %v171_v28 = vld [vmem:[#allocation7 + $0x18] sm:$0xff]  ;;  %v73_v29 = vld [vmem:[#allocation5] sm:$0xff] }
  0x2f   :  { %316 = vmatprep.subr.mxu0 %v477_v0  ;;  %351 = vmatprep.subr.mxu1 %v477_v0  ;;  %v72_v30 = vld [vmem:[#allocation2] sm:$0xff]  ;;  %v170_v31 = vld [vmem:[#allocation7 + $0x10] sm:$0xff]  ;;  %v169_v32 = vld [vmem:[#allocation7 + $0x8] sm:$0xff] }
  0x30   :  { %317 = vmatpush3.msra.mxu0 %v84_v6  ;;  %352 = vmatpush3.msra.mxu1 %v179_v12  ;;  %v168_v33 = vld [vmem:[#allocation7] sm:$0xff]  ;;  %v273_v34 = vld [vmem:[%s564_s2] ss:$0 sm:$0xff] }
  0x31   :  { %318 = vmatprep.subr.mxu0 %v477_v0  ;;  %353 = vmatprep.subr.mxu1 %v477_v0  ;;  %v272_v39 = vld [vmem:[%s566_s4] ss:$0 sm:$0xff] }
  0x32   :  { %319 = vmatpush3.msra.mxu0 %v83_v9  ;;  %354 = vmatpush3.msra.mxu1 %v178_v14 }
  0x33   :  { %320 = vmatprep.subr.mxu0 %v477_v0  ;;  %355 = vmatprep.subr.mxu1 %v477_v0 }
  0x34   :  { %321 = vmatpush3.msra.mxu0 %v82_v11  ;;  %356 = vmatpush3.msra.mxu1 %v177_v16 }
  0x35   :  { %322 = vmatprep.subr.mxu0 %v477_v0  ;;  %357 = vmatprep.subr.mxu1 %v477_v0 }
  0x36   :  { %323 = vmatpush3.msra.mxu0 %v81_v13  ;;  %358 = vmatpush3.msra.mxu1 %v176_v18 }
  0x37   :  { %324 = vmatprep.subr.mxu0 %v477_v0  ;;  %359 = vmatprep.subr.mxu1 %v477_v0 }
  0x38   :  { %325 = vmatpush3.msra.mxu0 %v80_v15  ;;  %360 = vmatpush3.msra.mxu1 %v175_v20 }
  0x39   :  { %326 = vmatprep.subr.mxu0 %v477_v0  ;;  %361 = vmatprep.subr.mxu1 %v477_v0 }
  0x3a   :  { %327 = vmatpush3.msra.mxu0 %v79_v17  ;;  %362 = vmatpush3.msra.mxu1 %v174_v22 }
  0x3b   :  { %328 = vmatprep.subr.mxu0 %v477_v0  ;;  %363 = vmatprep.subr.mxu1 %v477_v0 }
  0x3c   :  { %329 = vmatpush3.msra.mxu0 %v78_v19  ;;  %364 = vmatpush3.msra.mxu1 %v173_v24 }
  0x3d   :  { %330 = vmatprep.subr.mxu0 %v477_v0  ;;  %365 = vmatprep.subr.mxu1 %v477_v0 }
  0x3e   :  { %331 = vmatpush3.msra.mxu0 %v77_v21  ;;  %366 = vmatpush3.msra.mxu1 %v172_v26 }
  0x3f   :  { %332 = vmatprep.subr.mxu0 %v477_v0  ;;  %367 = vmatprep.subr.mxu1 %v477_v0 }
  0x40   :  { %333 = vmatpush3.msra.mxu0 %v76_v23  ;;  %368 = vmatpush3.msra.mxu1 %v171_v28 }
  0x41   :  { %334 = vmatprep.subr.mxu0 %v477_v0  ;;  %369 = vmatprep.subr.mxu1 %v477_v0 }
  0x42   :  { %335 = vmatpush3.msra.mxu0 %v75_v25  ;;  %370 = vmatpush3.msra.mxu1 %v170_v31 }
  0x43   :  { %336 = vmatprep.subr.mxu0 %v477_v0  ;;  %371 = vmatprep.subr.mxu1 %v477_v0 }
  0x44   :  { %337 = vmatpush3.msra.mxu0 %v74_v27  ;;  %372 = vmatpush3.msra.mxu1 %v169_v32 }
  0x45   :  { %338 = vmatprep.subr.mxu0 %v477_v0  ;;  %373 = vmatprep.subr.mxu1 %v477_v0 }
  0x46   :  { %339 = vmatpush3.msra.mxu0 %v73_v29  ;;  %374 = vmatpush3.msra.mxu1 %v168_v33 }
  0x47   :  { %341 = vmatmul.mubr.f32.vlgmr.msra.gmra.mxu0 %v72_v30 }
 0x107   :  { %v162_v35 = vpop.f32.mrf.mxu0 }
 0x108   :  { %v163_v36 = vadd.f32 %v273_v34, %v162_v35 }
 0x109   :  { %v342_v37 = vpop.f32.mrf.mxu0 }
 0x10a   :  { %v166_v38 = vmax.f32 %v163_v36, 0.0 }
 0x10c   :  { %376 = vmatmul.mubr.f32.vlgmr.msra.gmra.mxu1 %v166_v38 }
 0x1cc   :  { %v250_v40 = vpop.f32.mrf.mxu1 }
 0x1cd   :  { %v254_v41 = vadd.f32 %v272_v39, %v250_v40 }
 0x1ce   :  { %v377_v42 = vpop.f32.mrf.mxu1 }
 0x1cf   :  { %255 = vst [vmem:[#allocation8] sm:$0xff] %v254_v41 }
 0x1d0   :  { %457 = shalt.err (!%p454_p5)
}
 0x1d1   :  { %265 = dma.vmem_to_hbm [thread:$0]  %s263_s12, 128, %s567_s5, [#allocation4]  }
 0x1d2   :  { %470 = dma.done.wait [#allocation4], 128  }
 0x1d3   :  { %471 = vsyncadd [#allocation4], 4294967168 }
 0x1d4   :  { %269 = vsyncpa [#allocation3], 1 }
 0x1d5   :  { %270 = vsyncpa [#allocation6], 1 }
 0x1d6   :  { %271 = vsyncpa [#allocation4], 1 }

</bundles_post_ra>
